<compile_context>
chip_gen: v7x
topology: tpu7x:2x2x1
jax: 0.10.0
libtpu: 0.0.40
codegen_flags: <defaults>
</compile_context>

<pallas_src>
import jax
import jax.numpy as jnp
from jax.experimental import pallas as pl
from jax.experimental.pallas import tpu as pltpu

# ---- shapes (small, structure-preserving) -----------------------------------
B = 2                     # batch
C, H, W = 3, 16, 16
D_IN = C * H * W          # 768   (module: 3*224*224 = 150528)
H1 = 1024
H2 = 512
D_OUT = 2
D_OUT_PAD = 128           # lane-dense output slab; sliced back to D_OUT
TN = 512                  # H1 column tile: H1/TN = 2 parallel blocks (2 TCs on v7x)
VMEM_LIMIT = 48 * 1024 * 1024   # accommodates real-D_IN tiles; <= v7x 64 MiB physical


def _round_up(x, m):
    return (x + m - 1) // m * m


def pick_tk(d_in, cap=3584):
    """Largest multiple-of-128 exact divisor of d_in, capped.
    cap=3584 is v5e-safe (16 MiB default scoped VMEM); on v6e/v7x pass a
    larger cap (e.g. 10752 / 7168) for fewer K steps at the real D_IN."""
    best = 128
    for cand in range(128, min(d_in, cap) + 1, 128):
        if d_in % cand == 0:
            best = cand
    return best


# ---- kernel 1: K-tiled layer-1 GEMM (column-parallel across TensorCores) -----
def layer1_kernel(x_ref, w1_ref, b1_ref, h1_ref, acc_ref):
    k = pl.program_id(1)

    @pl.when(k == 0)
    def _():
        acc_ref[...] = jnp.zeros_like(acc_ref)

    # bf16 operands, f32 accumulation on the MXU.
    acc_ref[...] += jnp.dot(x_ref[...], w1_ref[...],
                            preferred_element_type=jnp.float32)

    @pl.when(k == pl.num_programs(1) - 1)
    def _():
        # Linear(D_IN,1024) epilogue + ReLU   (Dropout(0.3) identity at eval)
        h1 = jnp.maximum(acc_ref[...] + b1_ref[...], 0.0)
        h1_ref[...] = h1.astype(h1_ref.dtype)


# ---- kernel 2: fused layers 2 + 3 (tiny, fully VMEM-resident) -----------------
def head_kernel(h1_ref, w2_ref, b2_ref, w3_ref, b3_ref, o_ref):
    # Linear(1024,512) + ReLU                 (Dropout(0.5) identity at eval)
    h2 = jnp.dot(h1_ref[...], w2_ref[...], preferred_element_type=jnp.float32)
    h2 = jnp.maximum(h2 + b2_ref[...], 0.0)
    # Linear(512,2): bf16 operands, columns zero-padded to 128 (lane-dense)
    out = jnp.dot(h2.astype(jnp.bfloat16), w3_ref[...],
                  preferred_element_type=jnp.float32)
    o_ref[...] = (out + b3_ref[...]).astype(o_ref.dtype)


# ---- one-time weight preparation (hoisted out of the per-call path) ----------
def prepare_params(params, d_in_pad):
    """Cast/pad weights once; keep them resident in HBM across forward calls."""
    w1, b1, w2, b2, w3, b3 = params
    d_in = w1.shape[0]
    w1_p = jnp.zeros((d_in_pad, H1), jnp.bfloat16)
    w1_p = w1_p.at[:d_in, :].set(w1.astype(jnp.bfloat16))
    w2_b = w2.astype(jnp.bfloat16)
    w3_p = jnp.zeros((H2, D_OUT_PAD), jnp.bfloat16)
    w3_p = w3_p.at[:, :D_OUT].set(w3.astype(jnp.bfloat16))
    b3_p = jnp.zeros((1, D_OUT_PAD), jnp.float32)
    b3_p = b3_p.at[:, :D_OUT].set(b3)
    return (w1_p, b1, w2_b, b2, w3_p, b3_p)


# ---- forward ------------------------------------------------------------------
def dnn_forward(x_nchw, prep, *, tk):
    """x_nchw: (B, C, H, W) float32.  prep: prepare_params output.
    Returns logits (B, 2) float32."""
    w1_p, b1, w2_b, b2, w3_p, b3_p = prep
    b = x_nchw.shape[0]
    d_in_pad = w1_p.shape[0]
    assert d_in_pad % tk == 0 and tk % 128 == 0

    x_flat = x_nchw.reshape(b, -1)                 # nn.Flatten (layout glue)
    d_in = x_flat.shape[1]
    b_pad = _round_up(max(b, 16), 16)              # bf16 sublane packing = 16 rows
    x_p = jnp.zeros((b_pad, d_in_pad), jnp.bfloat16)
    x_p = x_p.at[:b, :d_in].set(x_flat.astype(jnp.bfloat16))

    num_k = d_in_pad // tk
    num_n = H1 // TN

    # Layer 1: K-tiled GEMM, f32 VMEM accumulator, H1-column blocks run in
    # parallel (megacore on v7x), K is the "arbitrary" reduction axis (last).
    h1 = pl.pallas_call(
        layer1_kernel,
        out_shape=jax.ShapeDtypeStruct((b_pad, H1), jnp.bfloat16),
        grid_spec=pltpu.PrefetchScalarGridSpec(
            num_scalar_prefetch=0,
            grid=(num_n, num_k),
            in_specs=[
                pl.BlockSpec((b_pad, tk), lambda n, k: (0, k)),   # x   (K-tiled)
                pl.BlockSpec((tk, TN), lambda n, k: (k, n)),      # W1  (K,N-tiled)
                pl.BlockSpec((1, TN), lambda n, k: (0, n)),       # b1
            ],
            out_specs=pl.BlockSpec((b_pad, TN), lambda n, k: (0, n)),
            scratch_shapes=[pltpu.VMEM((b_pad, TN), jnp.float32)],  # f32 acc
        ),
        compiler_params=pltpu.CompilerParams(
            dimension_semantics=("parallel", "arbitrary"),
            vmem_limit_bytes=VMEM_LIMIT,
        ),
    )(x_p, w1_p, b1)

    # Layers 2 + 3: tiny fused head; whole operands fit in VMEM (~1.2 MiB).
    out_pad = pl.pallas_call(
        head_kernel,
        out_shape=jax.ShapeDtypeStruct((b_pad, D_OUT_PAD), jnp.float32),
    )(h1, w2_b, b2, w3_p, b3_p)

    return out_pad[:b, :D_OUT]


# ---- deterministic parameter init (synthetic; no checkpoint) -----------------
def init_params(key):
    ks = jax.random.split(key, 6)

    def lin(kw, kb, fan_in, fan_out):
        # PyTorch nn.Linear default: U(-1/sqrt(fan_in), 1/sqrt(fan_in))
        bound = 1.0 / jnp.sqrt(jnp.float32(fan_in))
        w = jax.random.uniform(kw, (fan_in, fan_out), jnp.float32, -bound, bound)
        bb = jax.random.uniform(kb, (1, fan_out), jnp.float32, -bound, bound)
        return w, bb

    w1, b1 = lin(ks[0], ks[1], D_IN, H1)
    w2, b2 = lin(ks[2], ks[3], H1, H2)
    w3, b3 = lin(ks[4], ks[5], H2, D_OUT)
    return (w1, b1, w2, b2, w3, b3)


if __name__ == "__main__":
    key = jax.random.PRNGKey(0)
    k_x, k_p = jax.random.split(key)

    x = jax.random.normal(k_x, (B, C, H, W), jnp.float32)     # NCHW input
    params = init_params(k_p)

    # tk=384 divides D_IN=768 exactly -> 2 K-steps, exercising the accumulator
    # path.  For the real D_IN=150528 use pick_tk(d_in, cap=3584/10752/7168)
    # per chip generation (v5e / v6e / v7x).
    tk = 384
    d_in_pad = _round_up(D_IN, tk)                 # == D_IN (exact divisor)
    prep = prepare_params(params, d_in_pad)        # hoisted: once, not per call

    logits = dnn_forward(x, prep, tk=tk)
    logits = jax.block_until_ready(logits)

    # Reference with the same bf16 operand quantization (f32 accumulation).
    w1, b1, w2, b2, w3, b3 = params
    xf = x.reshape(B, -1)
    h1 = jnp.maximum(
        jnp.dot(xf.astype(jnp.bfloat16), w1.astype(jnp.bfloat16),
                preferred_element_type=jnp.float32) + b1, 0.0)
    h1 = h1.astype(jnp.bfloat16)
    h2 = jnp.maximum(
        jnp.dot(h1, w2.astype(jnp.bfloat16),
                preferred_element_type=jnp.float32) + b2, 0.0)
    ref = jnp.dot(h2.astype(jnp.bfloat16), w3.astype(jnp.bfloat16),
                  preferred_element_type=jnp.float32) + b3

    assert logits.shape == (B, D_OUT)
    err = float(jnp.max(jnp.abs(logits - ref)))
    assert jnp.allclose(logits, ref, atol=2e-2, rtol=2e-2), err

    print("KERNEL_OK")
</pallas_src>

<mosaic_0001>
module attributes {stable_mosaic.version = 11 : i64} {
  func.func @layer1_kernel(%arg0: i32, %arg1: i32, %arg2: memref<16x384xbf16, #tpu.memory_space<vmem>>, %arg3: memref<384x512xbf16, #tpu.memory_space<vmem>>, %arg4: memref<1x512xf32, #tpu.memory_space<vmem>>, %arg5: memref<16x512xbf16, #tpu.memory_space<vmem>>, %arg6: memref<16x512xf32, #tpu.memory_space<vmem>>) attributes {dimension_semantics = [#tpu.dimension_semantics<parallel>, #tpu.dimension_semantics<arbitrary>], iteration_bounds = array<i64: 2, 2>, scalar_prefetch = 0 : i64, scratch_operands = 1 : i64, tpu.core_type = #tpu.core_type<tc>, window_params = [{transform_indices = @transform_0, window_bounds = array<i64: 16, 384>}, {transform_indices = @transform_1, window_bounds = array<i64: 384, 512>}, {transform_indices = @transform_2, window_bounds = array<i64: 1, 512>}, {transform_indices = @transform_3, window_bounds = array<i64: 16, 512>}]} {
    %c0_i32 = arith.constant 0 : i32
    %0 = arith.cmpi eq, %arg1, %c0_i32 : i32
    %1 = arith.extui %0 : i1 to i32
    %c0_i32_0 = arith.constant 0 : i32
    %2 = arith.cmpi ne, %1, %c0_i32_0 : i32
    scf.if %2 {
      %cst_9 = arith.constant 0.000000e+00 : f32
      %12 = vector.broadcast %cst_9 : f32 to vector<16x512xf32>
      %c0_10 = arith.constant 0 : index
      %c0_11 = arith.constant 0 : index
      %13 = vector.load %arg6[%c0_10, %c0_11] : memref<16x512xf32, #tpu.memory_space<vmem>>, vector<16x512xf32>
      tpu.vector_store %arg6[%c0_10, %c0_11], %12 {strides = array<i32>} : memref<16x512xf32, #tpu.memory_space<vmem>>, vector<16x512xf32>,
    } else {
    }
    %c0 = arith.constant 0 : index
    %c0_1 = arith.constant 0 : index
    %3 = vector.load %arg6[%c0, %c0_1] : memref<16x512xf32, #tpu.memory_space<vmem>>, vector<16x512xf32>
    %c0_2 = arith.constant 0 : index
    %c0_3 = arith.constant 0 : index
    %4 = vector.load %arg2[%c0_2, %c0_3] : memref<16x384xbf16, #tpu.memory_space<vmem>>, vector<16x384xbf16>
    %c0_4 = arith.constant 0 : index
    %c0_5 = arith.constant 0 : index
    %5 = vector.load %arg3[%c0_4, %c0_5] : memref<384x512xbf16, #tpu.memory_space<vmem>>, vector<384x512xbf16>
    %cst = arith.constant dense<0.000000e+00> : vector<16x512xf32>
    %6 = tpu.matmul %4, %5, %cst {dimension_numbers = #tpu.dot_dimension_numbers<[1], [0], [0], [1], [0, 0, 1, 1], [], []>} : vector<16x384xbf16>, vector<384x512xbf16>, vector<16x512xf32> -> vector<16x512xf32>
    %7 = arith.addf %3, %6 : vector<16x512xf32>
    %c0_6 = arith.constant 0 : index
    %c0_7 = arith.constant 0 : index
    %8 = vector.load %arg6[%c0_6, %c0_7] : memref<16x512xf32, #tpu.memory_space<vmem>>, vector<16x512xf32>
    tpu.vector_store %arg6[%c0_6, %c0_7], %7 {strides = array<i32>} : memref<16x512xf32, #tpu.memory_space<vmem>>, vector<16x512xf32>,
    %c1_i32 = arith.constant 1 : i32
    %9 = arith.cmpi eq, %arg1, %c1_i32 : i32
    %10 = arith.extui %9 : i1 to i32
    %c0_i32_8 = arith.constant 0 : i32
    %11 = arith.cmpi ne, %10, %c0_i32_8 : i32
    scf.if %11 {
      %c0_9 = arith.constant 0 : index
      %c0_10 = arith.constant 0 : index
      %12 = vector.load %arg6[%c0_9, %c0_10] : memref<16x512xf32, #tpu.memory_space<vmem>>, vector<16x512xf32>
      %c0_11 = arith.constant 0 : index
      %c0_12 = arith.constant 0 : index
      %13 = vector.load %arg4[%c0_11, %c0_12] : memref<1x512xf32, #tpu.memory_space<vmem>>, vector<1x512xf32>
      %14 = vector.broadcast %13 : vector<1x512xf32> to vector<16x512xf32>
      %15 = arith.addf %12, %14 : vector<16x512xf32>
      %cst_13 = arith.constant 0.000000e+00 : f32
      %16 = vector.broadcast %cst_13 : f32 to vector<16x512xf32>
      %17 = arith.maximumf %15, %16 : vector<16x512xf32>
      %18 = arith.truncf %17 : vector<16x512xf32> to vector<16x512xbf16>
      %c0_14 = arith.constant 0 : index
      %c0_15 = arith.constant 0 : index
      %19 = vector.load %arg5[%c0_14, %c0_15] : memref<16x512xbf16, #tpu.memory_space<vmem>>, vector<16x512xbf16>
      tpu.vector_store %arg5[%c0_14, %c0_15], %18 {strides = array<i32>} : memref<16x512xbf16, #tpu.memory_space<vmem>>, vector<16x512xbf16>,
    } else {
    }
    return
  }
  func.func @transform_0(%arg0: i32, %arg1: i32) -> (i32, i32) {
    %c0_i32 = arith.constant 0 : i32
    %c0_i32_0 = arith.constant 0 : i32
    return %c0_i32, %arg1 : i32, i32
  }
  func.func @transform_1(%arg0: i32, %arg1: i32) -> (i32, i32) {
    %c0_i32 = arith.constant 0 : i32
    return %arg1, %arg0 : i32, i32
  }
  func.func @transform_2(%arg0: i32, %arg1: i32) -> (i32, i32) {
    %c0_i32 = arith.constant 0 : i32
    %c0_i32_0 = arith.constant 0 : i32
    return %c0_i32, %arg0 : i32, i32
  }
  func.func @transform_3(%arg0: i32, %arg1: i32) -> (i32, i32) {
    %c0_i32 = arith.constant 0 : i32
    %c0_i32_0 = arith.constant 0 : i32
    return %c0_i32, %arg0 : i32, i32
  }
}

</mosaic_0001>

<bundles_post_ra>
// kernel: tpu_custom_call.1
= control target key start
LH: loop header
LB: loop body
LE: loop exit
PB: predicated region body
PF: predicated region fallthrough
CT: control target
= control target key end

     0   :  { %s2566_s0 = inlined_call_operand.hbm [shape: bf16[16,768], index: 0, kind: input, shape index: {}]   ;;  %s2567_s1 = inlined_call_operand.hbm [shape: bf16[768,1024], index: 1, kind: input, shape index: {}]   ;;  %s2568_s2 = inlined_call_operand.hbm [shape: f32[1,1024], index: 2, kind: input, shape index: {}]   ;;  %s2569_s3 = inlined_call_operand.hbm [shape: bf16[16,1024], index: 3, kind: output, shape index: {}]  }
   0x1   :  { %2579 = sst [smem:[#allocation19_spill]] %s2566_s0 }
   0x2   :  { %2580 = sst [smem:[#allocation20_spill]] %s2567_s1 }
   0x3   :  { %2581 = sst [smem:[#allocation21_spill]] %s2569_s3 }
   0x4   :  { %8 = vsyncpa [#allocation4], 0 }
   0x5   :  { %10 = vsyncpa [#allocation4 + $0x1], 0 }
   0x6   :  { %11 = vsyncpa [#allocation7], 0 }
   0x7   :  { %13 = vsyncpa [#allocation7 + $0x1], 0 }
   0x8   :  { %14 = vsyncpa [#allocation5], 0 }
   0x9   :  { %16 = vsyncpa [#allocation5 + $0x1], 0  ;;  %s2033_s12 = smov 0   ;;  %s2035_s13 = smov 0  }
   0xa   :  { %s2037_s14 = smov 0   ;;  %s2039_s15 = smov 0  }
   0xb   :  { %s2041_s16 = smov 0   ;;  %s2043_s17 = smov 0  }
   0xc   :  { %s2045_s18 = smov 0   ;;  %s2047_s19 = smov 0  }
   0xd   :  { %s2049_s20 = smov 0   ;;  %s2051_s21 = smov 0  }
   0xe   :  { %s2053_s22 = smov 0   ;;  %s2055_s23 = smov 0  }
   0xf   :  { %s2057_s24 = smov 0   ;;  %s2059_s25 = smov 0  }
  0x10 LB: > { %2582 = sst [smem:[#allocation14_spill]] %s1980_s21  ;;  %s31_s26 = sadd.s32 1, %s1988_s23  ;;  %s1996_s25 = sphi %s2059_s25, %s22_s25   ;;  %s1992_s24 = sphi %s2057_s24, %s2636_s24   ;;  %s1988_s23 = sphi %s2055_s23, %s2635_s23   ;;  %s1984_s22 = sphi %s2053_s22, %s2634_s22   ;;  %s1980_s21 = sphi %s2051_s21, %s2633_s21   ;;  %s1976_s20 = sphi %s2049_s20, %s2632_s20   ;;  %s1972_s19 = sphi %s2047_s19, %s2631_s19   ;;  %s1968_s18 = sphi %s2045_s18, %s2630_s18   ;;  %s1964_s17 = sphi %s2043_s17, %s2629_s17   ;;  %s1960_s16 = sphi %s2041_s16, %s2628_s16   ;;  %s1956_s15 = sphi %s2039_s15, %s2627_s15   ;;  %s1952_s14 = sphi %s2037_s14, %s2626_s14   ;;  %s1948_s13 = sphi %s2035_s13, %s2625_s13   ;;  %s1944_s12 = sphi %s2033_s12, %s2624_s12  }
  0x11   : > { %2583 = sst [smem:[#allocation15_spill]] %s1984_s22  ;;  %p2105_p0 = scmp.ge.s32.totalorder %s31_s26, 2 }
  0x12   : > { %2584 = sst [smem:[#allocation16_spill]] %s1988_s23  ;;  %p2573_p1 = scmp.eq.s32.totalorder %s1996_s25, 0 }
  0x13   : > { %p76_p2 = scmp.ne.s32.totalorder %s1964_s17, %s1960_s16  ;;  %s2638_s26 = smov (%p2105_p0, %s31_s26), 0 }
  0x14   : > { %2586 = sst [smem:[#allocation17_spill]] %s2638_s26  ;;  %s2123_s30 = ssub.s32 %s1988_s23, %s2638_s26 }
  0x15   : > { %p78_p3 = por %p76_p2, %p2573_p1  ;;  %p2572_p6 = scmp.lt.s32.totalorder %s1996_s25, 4 }
  0x16   : > { %s179_s4 = sand.u32 1, %s1996_s25   ;;  %s181_s5 = sand.u32 1, %s1964_s17  }
  0x17   : > { %s1454_s6 = smul.u32 768, %s181_s5  ;;  %s1318_s7 = sshll.u32 %s1992_s24, 2 }
  0x18   : > { %s1438_s8 = smul.u32 384, %s1988_s23  ;;  %p2133_p7 = pnand %p2572_p6, %p78_p3 }
  0x19   : > { %s183_s11 = scalar_lea.vmem [#allocation6], %s1454_s6  ;;  %s2588_s1 = sld [smem:[#allocation20_spill]] }
  0x1a   : > { %s190_s10 = sadd.s32 %s1438_s8, %s1318_s7  ;;  %s193_s29 = sshll.u32 %s183_s11, 4  ;;  %s2137_s29 = int_to_ptr.vmem [resolvable:$true] %s193_s29 }
  0x1b   : > { %s1320_s27 = sshll.u32 %s190_s10, 6  ;;  %s2145_s5 = scalar_lea.sflag [#allocation7], %s179_s4 }
  0x1c   : > { %p1754_p10 = pneg %p2133_p7 }
  0x1f   : > { %s2142_s22 = scalar_lea.hbm %s2588_s1, %s1320_s27  ;;  %s1757_s3 = scalar_lea.hbm %s2588_s1, 49152 }
  0x20   : > { %s1752_s21 = scalar_lea.hbm %s2142_s22, 12288  ;;  %p1758_p13 = scmp.lt.u32.totalorder %s2142_s22, %s2588_s1 }
  0x21   : > { %p1753_p9 = scmp.ne.s32.totalorder %s2142_s22, %s1752_s21  ;;  %p1759_p2 = scmp.lt.u32.totalorder %s1757_s3, %s1752_s21 }
  0x22   : > { %p1761_p4 = scmp.lt.u32.totalorder %s1752_s21, %s2142_s22 }
  0x23   : > { %p1755_p11 = pnand %p1754_p10, %p1753_p9  ;;  %p1760_p3 = por %p1759_p2, %p1758_p13 }
  0x25   : > { %p1756_p12 = pneg %p1755_p11  ;;  %p1762_p6 = por %p1761_p4, %p1760_p3 }
  0x27   : > { %p1763_p1 = pnand %p1762_p6, %p1756_p12 }
  0x29   : > { %1766 = shalt.err (!%p1763_p1)
}
  0x2a   : > { %s1767_s4 = scalar_lea.vmem %s2137_s29, 12288  ;;  %s1998_s8 = smov [#allocation6]  }
  0x2b   : > { %p1768_p9 = scmp.ne.s32.totalorder %s2137_s29, %s1767_s4  ;;  %s1772_s10 = sshll.u32 %s1998_s8, 4  ;;  %s1773_s10 = int_to_ptr.vmem [resolvable:$false] %s1772_s10 }
  0x2c   : > { %s1774_s11 = scalar_lea.vmem %s1773_s10, 24576  ;;  %p1775_p8 = scmp.lt.s32.totalorder %s2137_s29, %s1773_s10 }
  0x2d   : > { %p1770_p11 = pnand %p1768_p9, %p1754_p10  ;;  %p1776_p13 = scmp.lt.s32.totalorder %s1774_s11, %s1767_s4 }
  0x2f   : > { %p1771_p5 = pneg %p1770_p11  ;;  %p1777_p2 = por %p1776_p13, %p1775_p8 }
  0x31   : > { %p1778_p4 = pnand %p1777_p2, %p1771_p5 }
  0x33   : > { %1781 = shalt.err (!%p1778_p4)
}
  0x34   : > { %s1999_s21 = smov 512   ;;  %s2000_s6 = smov 256  }
  0x35   : > { %s2001_s7 = smov 16   ;;  %p220_p1 = scmp.lt.s32.totalorder %s1996_s25, 5 }
  0x36   : > { %1471 = dma.hbm_to_vmem [thread:$0]  (!%p2133_p7), %s2142_s22, 12288, %s2137_s29, %s2145_s5, %s1999_s21, %s2000_s6, %s2001_s7  }
  0x37   : > { %p2589_p5 = scmp.ge.s32.totalorder %s1996_s25, 1  ;;  %s41_s26 = sadd.s32 1, %s1976_s20 }
  0x38   : > { %p48_p8 = scmp.ne.s32.totalorder %s1976_s20, %s1972_s19  ;;  %p2591_p10 = scmp.eq.s32.totalorder %s2123_s30, 0 }
  0x39   : > { %p2176_p6 = pnand %p2589_p5, %p220_p1  ;;  %p2592_p12 = scmp.eq.s32.totalorder %s1996_s25, 0 }
  0x3a   : > { %s2186_s27 = scalar_select %p2591_p10, %s1976_s20, %s41_s26  }
  0x3b   : > { %s2590_s3 = scalar_select %p2176_p6, 1, 0 }
  0x3c   : > { %p50_p3 = por %p2592_p12, %p48_p8  ;;  %s158_s4 = sand.u32 1, %s1976_s20  }
  0x3d   : > { %s1437_s8 = smul.u32 192, %s1988_s23  ;;  %s2593_s0 = sld [smem:[#allocation19_spill]] }
  0x3e   : > { %s1453_s10 = smul.u32 24, %s158_s4  ;;  %p2594_p7 = scmp.lt.s32.totalorder %s1996_s25, 4 }
  0x3f   : > { %s2207_s7 = scalar_lea.sflag [#allocation4], %s158_s4 }
  0x40   : > { %p2201_p11 = pnand %p2594_p7, %p50_p3  ;;  %s162_s21 = scalar_lea.vmem [#allocation3], %s1453_s10 }
  0x41   : > { %s169_s6 = sshll.u32 %s162_s21, 4  ;;  %s2205_s6 = int_to_ptr.vmem [resolvable:$true] %s169_s6 }
  0x42   : > { %p1784_p2 = pneg %p2201_p11 }
  0x43   : > { %s2197_s22 = scalar_lea.hbm %s2593_s0, %s1437_s8  ;;  %s1787_s9 = scalar_lea.hbm %s2593_s0, 768 }
  0x44   : > { %s1782_s26 = scalar_lea.hbm %s2197_s22, 384  ;;  %p1788_p5 = scmp.lt.u32.totalorder %s2197_s22, %s2593_s0 }
  0x45   : > { %p1783_p13 = scmp.ne.s32.totalorder %s2197_s22, %s1782_s26  ;;  %p1789_p8 = scmp.lt.u32.totalorder %s1787_s9, %s1782_s26 }
  0x46   : > { %p1791_p12 = scmp.lt.u32.totalorder %s1782_s26, %s2197_s22 }
  0x47   : > { %p1785_p4 = pnand %p1784_p2, %p1783_p13  ;;  %p1790_p10 = por %p1789_p8, %p1788_p5 }
  0x49   : > { %p1786_p1 = pneg %p1785_p4  ;;  %p1792_p3 = por %p1791_p12, %p1790_p10 }
  0x4b   : > { %p1793_p7 = pnand %p1792_p3, %p1786_p1 }
  0x4d   : > { %1796 = shalt.err (!%p1793_p7)
}
  0x4e   : > { %s1797_s4 = scalar_lea.vmem %s2205_s6, 384  ;;  %s2002_s10 = smov [#allocation3]  }
  0x4f   : > { %p1798_p13 = scmp.ne.s32.totalorder %s2205_s6, %s1797_s4  ;;  %s1802_s21 = sshll.u32 %s2002_s10, 4  ;;  %s1803_s21 = int_to_ptr.vmem [resolvable:$false] %s1802_s21 }
  0x50   : > { %s1804_s1 = scalar_lea.vmem %s1803_s21, 768  ;;  %p1805_p6 = scmp.lt.s32.totalorder %s2205_s6, %s1803_s21 }
  0x51   : > { %p1800_p4 = pnand %p1798_p13, %p1784_p2  ;;  %p1806_p5 = scmp.lt.s32.totalorder %s1804_s1, %s1797_s4 }
  0x53   : > { %p1801_p9 = pneg %p1800_p4  ;;  %p1807_p8 = por %p1806_p5, %p1805_p6 }
  0x55   : > { %p1808_p10 = pnand %p1807_p8, %p1801_p9 }
  0x57   : > { %1811 = shalt.err (!%p1808_p10)
}
  0x58   : > { %s2003_s23 = smov 384   ;;  %s2004_s26 = smov 192  }
  0x59   : > { %s2005_s8 = smov 12   ;;  %s2236_s11 = sadd.s32 4294967295, %s1996_s25  }
  0x5a   : > { %1468 = dma.hbm_to_vmem [thread:$0]  (!%p2201_p11), %s2197_s22, 384, %s2205_s6, %s2207_s7, %s2003_s23, %s2004_s26, %s2005_s8  }
  0x5b   : > { %s1314_s9 = sadd.s32 4294967294, %s1996_s25   ;;  %p55_p6 = scmp.eq.s32.totalorder %s2236_s11, 0 }
  0x5c   : > { %s2596_s4 = sadd.s32 1, %s1992_s24  ;;  %p2597_p9 = scmp.ne.s32.totalorder %s1972_s19, %s1968_s18 }
  0x5d   : > { %s2640_s4 = smov (!%p2105_p0, %s2596_s4), %s1992_s24  ;;  %p2599_p1 = scmp.ne.s32.totalorder %s1960_s16, %s1956_s15 }
  0x5e   : > { %p2248_p2 = por %p55_p6, %p2597_p9  ;;  %p36_p12 = scmp.ge.s32.totalorder %s2640_s4, 2 }
  0x5f   : > { %p2255_p11 = por %p2599_p1, %p55_p6  ;;  %s95_s29 = sadd.s32 1, %s1952_s14 }
  0x60   : > { %p102_p3 = scmp.ne.s32.totalorder %s1952_s14, %s1948_s13  ;;  %p108_p7 = scmp.ne.s32.totalorder %s1948_s13, %s1944_s12 }
  0x61   : > { %s2600_s22 = scalar_select %p2255_p11, 1, 0 }
  0x62   : > { %s2642_s4 = smov (%p36_p12, %s2640_s4), 0  ;;  %p2602_p0 = scmp.eq.s32.totalorder %s1996_s25, 0 }
  0x63   : > { %2601 = sst [smem:[#allocation18_spill]] %s2642_s4  ;;  %p2275_p4 = por %p108_p7, %p55_p6 }
  0x64   : > { %p2268_p13 = por %p102_p3, %p2602_p0  ;;  %s65_s28 = ssub.s32 %s1992_s24, %s2642_s4 }
  0x65   : > { %s2604_s18 = scalar_select %p2275_p4, 1, 0 }
  0x66   : > { %p132_p5 = scmp.eq.s32.totalorder %s2236_s11, 3  ;;  %s66_s6 = sor.u32 %s65_s28, %s2123_s30 }
  0x67   : > { %p93_p8 = scmp.eq.s32.totalorder %s65_s28, 0  ;;  %p67_p10 = scmp.eq.s32.totalorder %s66_s6, 0 }
  0x68   : > { %p2283_p9 = por %p132_p5, %p102_p3  ;;  %s2606_s1 = sadd.s32 1, %s1964_s17 }
  0x69   : > { %s2288_s21 = scalar_select %p93_p8, %s1952_s14, %s95_s29  }
  0x6a   : > { %s2605_s7 = scalar_select %p2283_p9, 1, 0 }
  0x6b   : > { %s2293_s23 = scalar_select %p67_p10, %s1964_s17, %s2606_s1  }
  0x6c   : > { %p138_p6 = scmp.eq.s32.totalorder %s1314_s9, 3  ;;  %s205_s26 = sand.u32 1, %s1952_s14  }
  0x6d   : > { %s1321_s8 = sshll.u32 %s205_s26, 2  ;;  %s1439_s0 = sshll.u32 %s1992_s24, 6 }
  0x6e   : > { %p2300_p1 = por %p138_p6, %p108_p7  ;;  %s2307_s6 = scalar_lea.hbm %s2568_s2, %s1439_s0 }
  0x6f   : > { %s207_s29 = scalar_lea.vmem [#allocation8], %s1321_s8  ;;  %p2608_p12 = scmp.lt.s32.totalorder %s1996_s25, 4 }
  0x70   : > { %s2607_s4 = scalar_select %p2300_p1, 1, 0 }
  0x71   : > { %s215_s1 = sshll.u32 %s207_s29, 4  ;;  %p2315_p3 = pnand %p2608_p12, %p2268_p13  ;;  %s2309_s1 = int_to_ptr.vmem [resolvable:$true] %s215_s1 }
  0x72   : > { %s1812_s26 = scalar_lea.hbm %s2307_s6, 64  ;;  %s1817_s30 = scalar_lea.hbm %s2568_s2, 128 }
  0x73   : > { %p1813_p7 = scmp.ne.s32.totalorder %s2307_s6, %s1812_s26  ;;  %p1814_p0 = pneg %p2315_p3 }
  0x74   : > { %p1818_p13 = scmp.lt.u32.totalorder %s2307_s6, %s2568_s2  ;;  %p1819_p10 = scmp.lt.u32.totalorder %s1817_s30, %s1812_s26 }
  0x75   : > { %p1815_p5 = pnand %p1814_p0, %p1813_p7  ;;  %p1821_p12 = scmp.lt.u32.totalorder %s1812_s26, %s2307_s6 }
  0x76   : > { %p1820_p6 = por %p1819_p10, %p1818_p13 }
  0x77   : > { %p1816_p8 = pneg %p1815_p5 }
  0x78   : > { %p1822_p1 = por %p1821_p12, %p1820_p6 }
  0x7a   : > { %p1823_p9 = pnand %p1822_p1, %p1816_p8 }
  0x7c   : > { %1826 = shalt.err (!%p1823_p9)
}
  0x7d   : > { %s1827_s29 = scalar_lea.vmem %s2309_s1, 64  ;;  %s2006_s0 = smov [#allocation8]  }
  0x7e   : > { %p1828_p7 = scmp.ne.s32.totalorder %s2309_s1, %s1827_s29  ;;  %s1832_s8 = sshll.u32 %s2006_s0, 4  ;;  %s1833_s8 = int_to_ptr.vmem [resolvable:$false] %s1832_s8 }
  0x7f   : > { %s1834_s15 = scalar_lea.vmem %s1833_s8, 128  ;;  %p1835_p11 = scmp.lt.s32.totalorder %s2309_s1, %s1833_s8 }
  0x80   : > { %p1830_p5 = pnand %p1828_p7, %p1814_p0  ;;  %p1836_p13 = scmp.lt.s32.totalorder %s1834_s15, %s1827_s29 }
  0x82   : > { %p1831_p4 = pneg %p1830_p5  ;;  %p1837_p10 = por %p1836_p13, %p1835_p11 }
  0x84   : > { %p1838_p6 = pnand %p1837_p10, %p1831_p4 }
  0x86   : > { %1841 = shalt.err (!%p1838_p6)
}
  0x87   : > { %1474 = dma.hbm_to_vmem [thread:$0]  (!%p2315_p3), %s2307_s6, 64, %s2309_s1, %s2145_s5  }
  0x88   : > { %p2610_p9 = scmp.ne.s32.totalorder %s2590_s3, 0 }
  0x89   : > { %s226_s26 = sand.u32 (!%p2610_p9), 1, %s1972_s19  }
  0x8a   : > { %224 = sbr.rel (%p2610_p9) target bundleno = 528 (0x210), region = 32  ;;  %s227_s28 = scalar_lea.sflag (!%p2610_p9), [#allocation4], %s226_s26 }
  0x8b   : > { %s1455_s30 = smul.u32 (!%p2610_p9), 24, %s226_s26 }
  0x8d   : > { %s2348_s0 = scalar_lea.vmem (!%p2610_p9), [#allocation3], %s1455_s30 }
  0x91   : > { %1927 = dma.done.wait (%p2248_p2), %s227_s28, 384  }
  0x92   : > { %1929 = vsyncadd (%p2248_p2), %s227_s28, 4294966912  ;;  %s235_s9 = sand.u32 1, %s2236_s11   ;;  %s237_s5 = sand.u32 1, %s1960_s16  }
  0x93   : > { %s1456_s6 = smul.u32 768, %s237_s5  ;;  %s236_s3 = scalar_lea.sflag [#allocation7], %s235_s9 }
  0x94   : > { %p2611_p11 = scmp.ne.s32.totalorder %s2600_s22, 0 }
  0x95   : > { %s2356_s1 = scalar_lea.vmem [#allocation6], %s1456_s6 }
  0x96   : > { %1931 = dma.done.wait (%p2611_p11), %s236_s3, 12288  }
  0x97   : > { %1933 = vsyncadd (%p2611_p11), %s236_s3, 4294955008  ;;  %s2363_s29 = sand.u32 1, %s1948_s13   ;;  %p2612_p2 = scmp.ne.s32.totalorder %s2604_s18, 0 }
  0x98   : > { %s1325_s10 = sshll.u32 %s2363_s29, 2 }
  0x99   : > { %s2366_s8 = scalar_lea.vmem [#allocation8], %s1325_s10 }
  0x9a   : > { %1935 = dma.done.wait (%p2612_p2), %s236_s3, 64  }
  0x9b   : > { %1937 = vsyncadd (%p2612_p2), %s236_s3, 4294967232  ;;  %s1326_s11 = sshll.u32 %s2363_s29, 5  ;;  %s2613_s26 = sld [smem:[#allocation14_spill]] }
  0x9c   : > { %s2373_s15 = scalar_lea.vmem [#allocation9], %s1326_s11 }
  0xa1   : > { %p1327_p4 = scmp.ne.s32.totalorder %s2613_s26, 0 }
  0xa2   : > { %v2007_v0 = vmov (!%p1327_p4), 0.0  }
  0xa3   : > { %290 = sbr.rel (%p1327_p4) target bundleno = 170 (0xaa), region = 48  ;;  %291 = vst [vmem:[#allocation2] sm:$0xff] (!%p1327_p4), %v2007_v0  ;;  %292 = vst [vmem:[#allocation2 + $0x8] sm:$0xff] (!%p1327_p4), %v2007_v0 }
  0xa4   : > { %293 = vst [vmem:[#allocation2 + $0x10] sm:$0xff] (!%p1327_p4), %v2007_v0  ;;  %294 = vst [vmem:[#allocation2 + $0x18] sm:$0xff] (!%p1327_p4), %v2007_v0 }
  0xa5   : > { %295 = vst [vmem:[#allocation2 + $0x20] sm:$0xff] (!%p1327_p4), %v2007_v0  ;;  %296 = vst [vmem:[#allocation2 + $0x28] sm:$0xff] (!%p1327_p4), %v2007_v0 }
  0xa6   : > { %297 = vst [vmem:[#allocation2 + $0x30] sm:$0xff] (!%p1327_p4), %v2007_v0  ;;  %298 = vst [vmem:[#allocation2 + $0x38] sm:$0xff] (!%p1327_p4), %v2007_v0 }
  0xaa PF: > { %v1604_v1 = vld [vmem:[%s2356_s1 + $0x4] ss:$16 sps:$4 sm:$0xff]   ;;  %v1606_v2 = vld [vmem:[%s2356_s1 + $0xc] ss:$16 sps:$4 sm:$0xff]   ;;  %v1608_v3 = vld [vmem:[%s2356_s1] ss:$16 sps:$4 sm:$0xff]  }
  0xab   : > { %903 = vmatprep.subr.bf16.mxu0 %v1604_v1  ;;  %v1609_v4 = vld [vmem:[%s2356_s1 + $0x8] ss:$16 sps:$4 sm:$0xff]   ;;  %989 = vmatprep.subr.bf16.mxu1 %v1606_v2  ;;  %v1610_v5 = vld [vmem:[%s2356_s1 + $0x24] ss:$16 sps:$4 sm:$0xff]   ;;  %v1612_v6 = vld [vmem:[%s2356_s1 + $0x2c] ss:$16 sps:$4 sm:$0xff]  }
  0xac   : > { %904 = vmatpush1.bf16.msra.mxu0 %v1608_v3  ;;  %990 = vmatpush1.bf16.msra.mxu1 %v1609_v4  ;;  %v1614_v7 = vld [vmem:[%s2356_s1 + $0x20] ss:$16 sps:$4 sm:$0xff]   ;;  %v1615_v8 = vld [vmem:[%s2356_s1 + $0x28] ss:$16 sps:$4 sm:$0xff]   ;;  %v1616_v9 = vld [vmem:[%s2356_s1 + $0x44] ss:$16 sps:$4 sm:$0xff]  }
  0xad   : > { %905 = vmatprep.subr.bf16.mxu0 %v1610_v5  ;;  %991 = vmatprep.subr.bf16.mxu1 %v1612_v6  ;;  %v1618_v10 = vld [vmem:[%s2356_s1 + $0x4c] ss:$16 sps:$4 sm:$0xff]   ;;  %v1620_v11 = vld [vmem:[%s2356_s1 + $0x40] ss:$16 sps:$4 sm:$0xff]   ;;  %v1621_v12 = vld [vmem:[%s2356_s1 + $0x48] ss:$16 sps:$4 sm:$0xff]  }
  0xae   : > { %v1622_v13 = vld [vmem:[%s2356_s1 + $0x64] ss:$16 sps:$4 sm:$0xff]   ;;  %v1624_v14 = vld [vmem:[%s2356_s1 + $0x6c] ss:$16 sps:$4 sm:$0xff]   ;;  %v1626_v15 = vld [vmem:[%s2356_s1 + $0x60] ss:$16 sps:$4 sm:$0xff]  }
  0xaf   : > { %v1627_v16 = vld [vmem:[%s2356_s1 + $0x68] ss:$16 sps:$4 sm:$0xff]   ;;  %v1628_v17 = vld [vmem:[%s2356_s1 + $0x84] ss:$16 sps:$4 sm:$0xff]   ;;  %v1630_v18 = vld [vmem:[%s2356_s1 + $0x8c] ss:$16 sps:$4 sm:$0xff]  }
  0xb0   : > { %906 = vmatpush1.bf16.msra.mxu0 %v1614_v7  ;;  %992 = vmatpush1.bf16.msra.mxu1 %v1615_v8  ;;  %v1632_v19 = vld [vmem:[%s2356_s1 + $0x80] ss:$16 sps:$4 sm:$0xff]   ;;  %v1633_v20 = vld [vmem:[%s2356_s1 + $0x88] ss:$16 sps:$4 sm:$0xff]   ;;  %v1634_v21 = vld [vmem:[%s2356_s1 + $0xa4] ss:$16 sps:$4 sm:$0xff]  }
  0xb1   : > { %907 = vmatprep.subr.bf16.mxu0 %v1616_v9  ;;  %993 = vmatprep.subr.bf16.mxu1 %v1618_v10  ;;  %v1636_v22 = vld [vmem:[%s2356_s1 + $0xac] ss:$16 sps:$4 sm:$0xff]   ;;  %v1638_v23 = vld [vmem:[%s2356_s1 + $0xa0] ss:$16 sps:$4 sm:$0xff]   ;;  %v1639_v24 = vld [vmem:[%s2356_s1 + $0xa8] ss:$16 sps:$4 sm:$0xff]  }
  0xb2   : > { %v1640_v25 = vld [vmem:[%s2356_s1 + $0xc4] ss:$16 sps:$4 sm:$0xff]   ;;  %v1642_v26 = vld [vmem:[%s2356_s1 + $0xcc] ss:$16 sps:$4 sm:$0xff]   ;;  %v1644_v27 = vld [vmem:[%s2356_s1 + $0xc0] ss:$16 sps:$4 sm:$0xff]  }
  0xb3   : > { %v1645_v28 = vld [vmem:[%s2356_s1 + $0xc8] ss:$16 sps:$4 sm:$0xff]   ;;  %v1646_v29 = vld [vmem:[%s2356_s1 + $0xe4] ss:$16 sps:$4 sm:$0xff]   ;;  %v1648_v30 = vld [vmem:[%s2356_s1 + $0xec] ss:$16 sps:$4 sm:$0xff]  }
  0xb4   : > { %908 = vmatpush1.bf16.msra.mxu0 %v1620_v11  ;;  %994 = vmatpush1.bf16.msra.mxu1 %v1621_v12  ;;  %v1650_v31 = vld [vmem:[%s2356_s1 + $0xe0] ss:$16 sps:$4 sm:$0xff]   ;;  %v1651_v32 = vld [vmem:[%s2356_s1 + $0xe8] ss:$16 sps:$4 sm:$0xff]   ;;  %v1652_v33 = vld [vmem:[%s2356_s1 + $0x104] ss:$16 sps:$4 sm:$0xff]  }
  0xb5   : > { %909 = vmatprep.subr.bf16.mxu0 %v1622_v13  ;;  %995 = vmatprep.subr.bf16.mxu1 %v1624_v14  ;;  %v1654_v34 = vld [vmem:[%s2356_s1 + $0x10c] ss:$16 sps:$4 sm:$0xff]   ;;  %v1656_v35 = vld [vmem:[%s2356_s1 + $0x100] ss:$16 sps:$4 sm:$0xff]   ;;  %v1657_v36 = vld [vmem:[%s2356_s1 + $0x108] ss:$16 sps:$4 sm:$0xff]  }
  0xb6   : > { %v1658_v37 = vld [vmem:[%s2356_s1 + $0x124] ss:$16 sps:$4 sm:$0xff]   ;;  %v1660_v38 = vld [vmem:[%s2356_s1 + $0x12c] ss:$16 sps:$4 sm:$0xff]   ;;  %v1662_v39 = vld [vmem:[%s2356_s1 + $0x120] ss:$16 sps:$4 sm:$0xff]  }
  0xb7   : > { %v1663_v40 = vld [vmem:[%s2356_s1 + $0x128] ss:$16 sps:$4 sm:$0xff]   ;;  %v1664_v41 = vld [vmem:[%s2356_s1 + $0x144] ss:$16 sps:$4 sm:$0xff]   ;;  %v1666_v42 = vld [vmem:[%s2356_s1 + $0x14c] ss:$16 sps:$4 sm:$0xff]  }
  0xb8   : > { %910 = vmatpush1.bf16.msra.mxu0 %v1626_v15  ;;  %996 = vmatpush1.bf16.msra.mxu1 %v1627_v16  ;;  %v1668_v43 = vld [vmem:[%s2356_s1 + $0x140] ss:$16 sps:$4 sm:$0xff]   ;;  %v1669_v44 = vld [vmem:[%s2356_s1 + $0x148] ss:$16 sps:$4 sm:$0xff]   ;;  %v1670_v45 = vld [vmem:[%s2356_s1 + $0x164] ss:$16 sps:$4 sm:$0xff]  }
  0xb9   : > { %911 = vmatprep.subr.bf16.mxu0 %v1628_v17  ;;  %997 = vmatprep.subr.bf16.mxu1 %v1630_v18  ;;  %v1672_v46 = vld [vmem:[%s2356_s1 + $0x16c] ss:$16 sps:$4 sm:$0xff]   ;;  %v1674_v47 = vld [vmem:[%s2356_s1 + $0x160] ss:$16 sps:$4 sm:$0xff]   ;;  %v1675_v48 = vld [vmem:[%s2356_s1 + $0x168] ss:$16 sps:$4 sm:$0xff]  }
  0xba   : > { %v1702_v49 = vld [vmem:[%s2348_s0 + $0x4] ss:$12 sps:$4 sm:$0xff]   ;;  %v1700_v4 = vld [vmem:[%s2348_s0] ss:$12 sps:$4 sm:$0xff]   ;;  %v2008_v13 = vmov 0   ;;  %s2614_s22 = sld [smem:[#allocation14_spill]] }
  0xbb   : > { %v1676_v50 = vld [vmem:[%s2356_s1 + $0x184] ss:$16 sps:$4 sm:$0xff]   ;;  %v1678_v51 = vld [vmem:[%s2356_s1 + $0x18c] ss:$16 sps:$4 sm:$0xff]   ;;  %935 = vmatprep.mubr.bf16.mxu0 %v1702_v49  ;;  %1021 = vmatprep.mubr.bf16.mxu1 %v1702_v49  ;;  %v1680_v52 = vld [vmem:[%s2356_s1 + $0x180] ss:$16 sps:$4 sm:$0xff]  }
  0xbc   : > { %912 = vmatpush1.bf16.msra.mxu0 %v1632_v19  ;;  %998 = vmatpush1.bf16.msra.mxu1 %v1633_v20  ;;  %v1681_v53 = vld [vmem:[%s2356_s1 + $0x188] ss:$16 sps:$4 sm:$0xff]   ;;  %v1682_v54 = vld [vmem:[%s2356_s1 + $0x1a4] ss:$16 sps:$4 sm:$0xff]   ;;  %v1684_v55 = vld [vmem:[%s2356_s1 + $0x1ac] ss:$16 sps:$4 sm:$0xff]  }
  0xbd   : > { %913 = vmatprep.subr.bf16.mxu0 %v1634_v21  ;;  %999 = vmatprep.subr.bf16.mxu1 %v1636_v22  ;;  %v1686_v56 = vld [vmem:[%s2356_s1 + $0x1a0] ss:$16 sps:$4 sm:$0xff]   ;;  %v1687_v57 = vld [vmem:[%s2356_s1 + $0x1a8] ss:$16 sps:$4 sm:$0xff]   ;;  %v1688_v58 = vld [vmem:[%s2356_s1 + $0x1c4] ss:$16 sps:$4 sm:$0xff]  }
  0xbe   : > { %v1690_v59 = vld [vmem:[%s2356_s1 + $0x1cc] ss:$16 sps:$4 sm:$0xff]   ;;  %v1692_v60 = vld [vmem:[%s2356_s1 + $0x1c0] ss:$16 sps:$4 sm:$0xff]   ;;  %v1693_v61 = vld [vmem:[%s2356_s1 + $0x1c8] ss:$16 sps:$4 sm:$0xff]  }
  0xbf   : > { %v1694_v62 = vld [vmem:[%s2356_s1 + $0x1e4] ss:$16 sps:$4 sm:$0xff]   ;;  %v1696_v63 = vld [vmem:[%s2356_s1 + $0x1ec] ss:$16 sps:$4 sm:$0xff]   ;;  %v1698_v0 = vld [vmem:[%s2356_s1 + $0x1e0] ss:$16 sps:$4 sm:$0xff]  }
  0xc0   : > { %914 = vmatpush1.bf16.msra.mxu0 %v1638_v23  ;;  %1000 = vmatpush1.bf16.msra.mxu1 %v1639_v24  ;;  %v1699_v1 = vld [vmem:[%s2356_s1 + $0x1e8] ss:$16 sps:$4 sm:$0xff]   ;;  %v1705_v2 = vld [vmem:[%s2356_s1 + $0x204] ss:$16 sps:$4 sm:$0xff]   ;;  %v1708_v3 = vld [vmem:[%s2356_s1 + $0x20c] ss:$16 sps:$4 sm:$0xff]  }
  0xc1   : > { %915 = vmatprep.subr.bf16.mxu0 %v1640_v25  ;;  %1001 = vmatprep.subr.bf16.mxu1 %v1642_v26  ;;  %v1703_v5 = vld [vmem:[%s2356_s1 + $0x200] ss:$16 sps:$4 sm:$0xff]   ;;  %v1706_v6 = vld [vmem:[%s2356_s1 + $0x208] ss:$16 sps:$4 sm:$0xff]   ;;  %v1711_v7 = vld [vmem:[%s2356_s1 + $0x224] ss:$16 sps:$4 sm:$0xff]  }
  0xc2   : > { %v1714_v8 = vld [vmem:[%s2356_s1 + $0x22c] ss:$16 sps:$4 sm:$0xff]   ;;  %v1709_v9 = vld [vmem:[%s2356_s1 + $0x220] ss:$16 sps:$4 sm:$0xff]   ;;  %v1712_v10 = vld [vmem:[%s2356_s1 + $0x228] ss:$16 sps:$4 sm:$0xff]  }
  0xc3   : > { %v1717_v11 = vld [vmem:[%s2356_s1 + $0x244] ss:$16 sps:$4 sm:$0xff]   ;;  %v1720_v12 = vld [vmem:[%s2356_s1 + $0x24c] ss:$16 sps:$4 sm:$0xff]   ;;  %v1715_v14 = vld [vmem:[%s2356_s1 + $0x240] ss:$16 sps:$4 sm:$0xff]  }
  0xc4   : > { %916 = vmatpush1.bf16.msra.mxu0 %v1644_v27  ;;  %1002 = vmatpush1.bf16.msra.mxu1 %v1645_v28  ;;  %v1718_v15 = vld [vmem:[%s2356_s1 + $0x248] ss:$16 sps:$4 sm:$0xff]   ;;  %v1723_v16 = vld [vmem:[%s2356_s1 + $0x264] ss:$16 sps:$4 sm:$0xff]   ;;  %v1726_v17 = vld [vmem:[%s2356_s1 + $0x26c] ss:$16 sps:$4 sm:$0xff]  }
  0xc5   : > { %917 = vmatprep.subr.bf16.mxu0 %v1646_v29  ;;  %1003 = vmatprep.subr.bf16.mxu1 %v1648_v30  ;;  %v1721_v18 = vld [vmem:[%s2356_s1 + $0x260] ss:$16 sps:$4 sm:$0xff]   ;;  %v1724_v19 = vld [vmem:[%s2356_s1 + $0x268] ss:$16 sps:$4 sm:$0xff]   ;;  %v1729_v20 = vld [vmem:[%s2356_s1 + $0x284] ss:$16 sps:$4 sm:$0xff]  }
  0xc6   : > { %v1732_v21 = vld [vmem:[%s2356_s1 + $0x28c] ss:$16 sps:$4 sm:$0xff]   ;;  %v1727_v22 = vld [vmem:[%s2356_s1 + $0x280] ss:$16 sps:$4 sm:$0xff]   ;;  %v1730_v23 = vld [vmem:[%s2356_s1 + $0x288] ss:$16 sps:$4 sm:$0xff]  }
  0xc7   : > { %v1735_v24 = vld [vmem:[%s2356_s1 + $0x2a4] ss:$16 sps:$4 sm:$0xff]   ;;  %v1738_v25 = vld [vmem:[%s2356_s1 + $0x2ac] ss:$16 sps:$4 sm:$0xff]   ;;  %v1733_v26 = vld [vmem:[%s2356_s1 + $0x2a0] ss:$16 sps:$4 sm:$0xff]  }
  0xc8   : > { %918 = vmatpush1.bf16.msra.mxu0 %v1650_v31  ;;  %1004 = vmatpush1.bf16.msra.mxu1 %v1651_v32  ;;  %v1736_v27 = vld [vmem:[%s2356_s1 + $0x2a8] ss:$16 sps:$4 sm:$0xff]   ;;  %v1741_v28 = vld [vmem:[%s2356_s1 + $0x2c4] ss:$16 sps:$4 sm:$0xff]   ;;  %v1744_v29 = vld [vmem:[%s2356_s1 + $0x2cc] ss:$16 sps:$4 sm:$0xff]  }
  0xc9   : > { %919 = vmatprep.subr.bf16.mxu0 %v1652_v33  ;;  %1005 = vmatprep.subr.bf16.mxu1 %v1654_v34  ;;  %v1739_v30 = vld [vmem:[%s2356_s1 + $0x2c0] ss:$16 sps:$4 sm:$0xff]   ;;  %v1742_v31 = vld [vmem:[%s2356_s1 + $0x2c8] ss:$16 sps:$4 sm:$0xff]   ;;  %v1747_v32 = vld [vmem:[%s2356_s1 + $0x2e4] ss:$16 sps:$4 sm:$0xff]  }
  0xca   : > { %v1750_v33 = vld [vmem:[%s2356_s1 + $0x2ec] ss:$16 sps:$4 sm:$0xff]   ;;  %v1745_v34 = vld [vmem:[%s2356_s1 + $0x2e0] ss:$16 sps:$4 sm:$0xff]   ;;  %p1427_p1 = scmp.ne.s32.totalorder %s2614_s22, 1 }
  0xcb   : > { %v304_v49 = vld [vmem:[#allocation2 + $0x28] sm:$0xff] }
  0xcc   : > { %920 = vmatpush1.bf16.msra.mxu0 %v1656_v35  ;;  %1006 = vmatpush1.bf16.msra.mxu1 %v1657_v36  ;;  %v1748_v35 = vld [vmem:[%s2356_s1 + $0x2e8] ss:$16 sps:$4 sm:$0xff]  }
  0xcd   : > { %921 = vmatprep.subr.bf16.mxu0 %v1658_v37  ;;  %1007 = vmatprep.subr.bf16.mxu1 %v1660_v38  ;;  %v1751_v36 = vld [vmem:[%s2348_s0 + $0x8] ss:$12 sps:$4 sm:$0xff]  }
  0xce   : > { %v299_v37 = vld [vmem:[#allocation2] sm:$0xff]  ;;  %v301_v38 = vld [vmem:[#allocation2 + $0x10] sm:$0xff] }
  0xd0   : > { %922 = vmatpush1.bf16.msra.mxu0 %v1662_v39  ;;  %1008 = vmatpush1.bf16.msra.mxu1 %v1663_v40  ;;  %v300_v39 = vld [vmem:[#allocation2 + $0x8] sm:$0xff]  ;;  %v302_v40 = vld [vmem:[#allocation2 + $0x18] sm:$0xff] }
  0xd1   : > { %923 = vmatprep.subr.bf16.mxu0 %v1664_v41  ;;  %1009 = vmatprep.subr.bf16.mxu1 %v1666_v42 }
  0xd4   : > { %924 = vmatpush1.bf16.msra.mxu0 %v1668_v43  ;;  %1010 = vmatpush1.bf16.msra.mxu1 %v1669_v44  ;;  %v303_v43 = vld [vmem:[#allocation2 + $0x20] sm:$0xff]  ;;  %v305_v44 = vld [vmem:[#allocation2 + $0x30] sm:$0xff] }
  0xd5   : > { %925 = vmatprep.subr.bf16.mxu0 %v1670_v45  ;;  %1011 = vmatprep.subr.bf16.mxu1 %v1672_v46 }
  0xd8   : > { %926 = vmatpush1.bf16.msra.mxu0 %v1674_v47  ;;  %1012 = vmatpush1.bf16.msra.mxu1 %v1675_v48 }
  0xd9   : > { %927 = vmatprep.subr.bf16.mxu0 %v1676_v50  ;;  %1013 = vmatprep.subr.bf16.mxu1 %v1678_v51  ;;  %v306_v50 = vld [vmem:[#allocation2 + $0x38] sm:$0xff] }
  0xdc   : > { %928 = vmatpush1.bf16.msra.mxu0 %v1680_v52  ;;  %1014 = vmatpush1.bf16.msra.mxu1 %v1681_v53 }
  0xdd   : > { %929 = vmatprep.subr.bf16.mxu0 %v1682_v54  ;;  %1015 = vmatprep.subr.bf16.mxu1 %v1684_v55 }
  0xe0   : > { %930 = vmatpush1.bf16.msra.mxu0 %v1686_v56  ;;  %1016 = vmatpush1.bf16.msra.mxu1 %v1687_v57 }
  0xe1   : > { %931 = vmatprep.subr.bf16.mxu0 %v1688_v58  ;;  %1017 = vmatprep.subr.bf16.mxu1 %v1690_v59 }
  0xe4   : > { %932 = vmatpush1.bf16.msra.mxu0 %v1692_v60  ;;  %1018 = vmatpush1.bf16.msra.mxu1 %v1693_v61  ;;  %v1105_v61 = vlaneseq (!%p1427_p1) }
  0xe5   : > { %933 = vmatprep.subr.bf16.mxu0 %v1694_v62  ;;  %1019 = vmatprep.subr.bf16.mxu1 %v1696_v63  ;;  %v1103_v63 = vld [vmem:[%s2366_s8] sm:$0xf] (!%p1427_p1) }
  0xe6   : > { %v1106_v62 = vshrl.u32 (!%p1427_p1), %v1105_v61, 7 }
  0xe8   : > { %934 = vmatpush1.bf16.msra.mxu0 %v1698_v0  ;;  %1020 = vmatpush1.bf16.msra.mxu1 %v1699_v1 }
  0xe9   : > { %946 = vmatprep.subr.bf16.mxu0 %v1705_v2  ;;  %1032 = vmatprep.subr.bf16.mxu1 %v1708_v3  ;;  %v1107_v2 = vsub.s32 (!%p1427_p1), 0, %v1106_v62  ;;  %v1111_v3 = vsub.s32 (!%p1427_p1), 1, %v1106_v62 }
  0xeb   : > { %936 = vmatmul.mubr.bf16.vlgmr.msra.gmra.mrb[0].mxu0 %v1700_v4  ;;  %1022 = vmatmul.mubr.bf16.vlgmr.msra.gmra.mrb[0].mxu1 %v1700_v4  ;;  %v1115_v4 = vsub.s32 (!%p1427_p1), 2, %v1106_v62 }
  0xec   : > { %947 = vmatpush1.bf16.msra.mxu0 %v1703_v5  ;;  %1033 = vmatpush1.bf16.msra.mxu1 %v1706_v6  ;;  %v1119_v5 = vsub.s32 (!%p1427_p1), 3, %v1106_v62 }
  0xed   : > { %948 = vmatprep.subr.bf16.mxu0 %v1711_v7  ;;  %1034 = vmatprep.subr.bf16.mxu1 %v1714_v8 }
  0xee   : > { %978 = vmatprep.mubr.bf16.mxu0 %v2008_v13  ;;  %1064 = vmatprep.mubr.bf16.mxu1 %v2008_v13 }
  0xf0   : > { %949 = vmatpush1.bf16.msra.mxu0 %v1709_v9  ;;  %1035 = vmatpush1.bf16.msra.mxu1 %v1712_v10  ;;  %v1108_v9 = vrot.slane (!%p1427_p1), %v1103_v63, %v1107_v2  ;;  %v1112_v10 = vrot.slane (!%p1427_p1), %v1103_v63, %v1111_v3 }
  0xf1   : > { %950 = vmatprep.subr.bf16.mxu0 %v1717_v11  ;;  %1036 = vmatprep.subr.bf16.mxu1 %v1720_v12  ;;  %v1116_v11 = vrot.slane (!%p1427_p1), %v1103_v63, %v1115_v4  ;;  %v1120_v12 = vrot.slane (!%p1427_p1), %v1103_v63, %v1119_v5 }
  0xf4   : > { %951 = vmatpush1.bf16.msra.mxu0 %v1715_v14  ;;  %1037 = vmatpush1.bf16.msra.mxu1 %v1718_v15 }
  0xf5   : > { %952 = vmatprep.subr.bf16.mxu0 %v1723_v16  ;;  %1038 = vmatprep.subr.bf16.mxu1 %v1726_v17 }
  0xf8   : > { %953 = vmatpush1.bf16.msra.mxu0 %v1721_v18  ;;  %1039 = vmatpush1.bf16.msra.mxu1 %v1724_v19 }
  0xf9   : > { %954 = vmatprep.subr.bf16.mxu0 %v1729_v20  ;;  %1040 = vmatprep.subr.bf16.mxu1 %v1732_v21 }
  0xfc   : > { %955 = vmatpush1.bf16.msra.mxu0 %v1727_v22  ;;  %1041 = vmatpush1.bf16.msra.mxu1 %v1730_v23 }
  0xfd   : > { %956 = vmatprep.subr.bf16.mxu0 %v1735_v24  ;;  %1042 = vmatprep.subr.bf16.mxu1 %v1738_v25 }
 0x100   : > { %957 = vmatpush1.bf16.msra.mxu0 %v1733_v26  ;;  %1043 = vmatpush1.bf16.msra.mxu1 %v1736_v27 }
 0x101   : > { %958 = vmatprep.subr.bf16.mxu0 %v1741_v28  ;;  %1044 = vmatprep.subr.bf16.mxu1 %v1744_v29 }
 0x104   : > { %959 = vmatpush1.bf16.msra.mxu0 %v1739_v30  ;;  %1045 = vmatpush1.bf16.msra.mxu1 %v1742_v31 }
 0x105   : > { %960 = vmatprep.subr.bf16.mxu0 %v1747_v32  ;;  %1046 = vmatprep.subr.bf16.mxu1 %v1750_v33 }
 0x108   : > { %961 = vmatpush1.bf16.msra.mxu0 %v1745_v34  ;;  %1047 = vmatpush1.bf16.msra.mxu1 %v1748_v35 }
 0x10b   : > { %979 = vmatmul.mubr.bf16.vlgmr.msra.gmra.mrb[0].mxu0 %v1751_v36  ;;  %1065 = vmatmul.mubr.bf16.vlgmr.msra.gmra.mrb[0].mxu1 %v1751_v36 }
 0x1de   : > { %v980_v41 = vpop.f32.mrb[0].mxu0  ;;  %v1066_v42 = vpop.f32.mrb[0].mxu1  ;;  %1094 = sbr.rel (%p1427_p1) target bundleno = 499 (0x1f3), region = 52 }
 0x1df   : > { %v1075_v45 = vadd.f32 %v980_v41, %v299_v37  ;;  %v1077_v46 = vadd.f32 %v1066_v42, %v301_v38  ;;  %v982_v47 = vpop.f32.mrb[1].mxu0  ;;  %v1068_v48 = vpop.f32.mrb[1].mxu1 }
 0x1e0   : > { %v1076_v51 = vadd.f32 %v982_v47, %v300_v39  ;;  %v1078_v52 = vadd.f32 %v1068_v48, %v302_v40  ;;  %v984_v53 = vpop.f32.mrb[2].mxu0  ;;  %v1070_v54 = vpop.f32.mrb[2].mxu1 }
 0x1e1   : > { %1083 = vst [vmem:[#allocation2] sm:$0xff] %v1075_v45  ;;  %1085 = vst [vmem:[#allocation2 + $0x10] sm:$0xff] %v1077_v46  ;;  %v1079_v55 = vadd.f32 %v984_v53, %v303_v43  ;;  %v1081_v56 = vadd.f32 %v1070_v54, %v305_v44  ;;  %v986_v57 = vpop.f32.mrb[3].mxu0  ;;  %v1072_v58 = vpop.f32.mrb[3].mxu1 }
 0x1e2   : > { %1084 = vst [vmem:[#allocation2 + $0x8] sm:$0xff] %v1076_v51  ;;  %1086 = vst [vmem:[#allocation2 + $0x18] sm:$0xff] %v1078_v52  ;;  %v1080_v59 = vadd.f32 %v986_v57, %v304_v49  ;;  %v1082_v60 = vadd.f32 %v1072_v58, %v306_v50 }
 0x1e3   : > { %1087 = vst [vmem:[#allocation2 + $0x20] sm:$0xff] %v1079_v55  ;;  %1089 = vst [vmem:[#allocation2 + $0x30] sm:$0xff] %v1081_v56 }
 0x1e4   : > { %1088 = vst [vmem:[#allocation2 + $0x28] sm:$0xff] %v1080_v59  ;;  %1090 = vst [vmem:[#allocation2 + $0x38] sm:$0xff] %v1082_v60 }
 0x1e8   : > { %v1095_v0 = vld [vmem:[#allocation2] sm:$0xff]  ;;  %v1097_v6 = vld [vmem:[#allocation2 + $0x10] sm:$0xff] }
 0x1e9   : > { %v1096_v1 = vld [vmem:[#allocation2 + $0x8] sm:$0xff]  ;;  %v1098_v7 = vld [vmem:[#allocation2 + $0x18] sm:$0xff]  ;;  %v1125_v16 = vadd.f32 %v1108_v9, %v1095_v0  ;;  %v1127_v18 = vadd.f32 %v1116_v11, %v1097_v6 }
 0x1ea   : > { %v1099_v8 = vld [vmem:[#allocation2 + $0x20] sm:$0xff]  ;;  %v1101_v14 = vld [vmem:[#allocation2 + $0x30] sm:$0xff]  ;;  %v1126_v17 = vadd.f32 %v1112_v10, %v1096_v1  ;;  %v1128_v19 = vadd.f32 %v1120_v12, %v1098_v7 }
 0x1eb   : > { %v1100_v13 = vld [vmem:[#allocation2 + $0x28] sm:$0xff]  ;;  %v1102_v15 = vld [vmem:[#allocation2 + $0x38] sm:$0xff]  ;;  %v1129_v20 = vadd.f32 %v1108_v9, %v1099_v8  ;;  %v1131_v22 = vadd.f32 %v1116_v11, %v1101_v14  ;;  %v1133_v24 = vmax.f32 %v1125_v16, 0.0  ;;  %v1135_v26 = vmax.f32 %v1127_v18, 0.0 }
 0x1ec   : > { %v1130_v21 = vadd.f32 %v1112_v10, %v1100_v13  ;;  %v1132_v23 = vadd.f32 %v1120_v12, %v1102_v15  ;;  %v1134_v25 = vmax.f32 %v1126_v17, 0.0  ;;  %v1136_v27 = vmax.f32 %v1128_v19, 0.0 }
 0x1ed   : > { %v1137_v28 = vmax.f32 %v1129_v20, 0.0  ;;  %v1139_v30 = vmax.f32 %v1131_v22, 0.0 }
 0x1ee   : > { %v1138_v29 = vmax.f32 %v1130_v21, 0.0  ;;  %v1140_v31 = vmax.f32 %v1132_v23, 0.0  ;;  %v1440_v32 = vpack.c.bf16 %v1134_v25, %v1133_v24  ;;  %v1441_v33 = vpack.c.bf16 %v1136_v27, %v1135_v26 }
 0x1f0   : > { %v1442_v34 = vpack.c.bf16 %v1138_v29, %v1137_v28  ;;  %v1443_v35 = vpack.c.bf16 %v1140_v31, %v1139_v30  ;;  %1165 = vst [vmem:[%s2373_s15] sm:$0xff] %v1440_v32  ;;  %1166 = vst [vmem:[%s2373_s15 + $0x8] sm:$0xff] %v1441_v33 }
 0x1f2   : > { %1167 = vst [vmem:[%s2373_s15 + $0x10] sm:$0xff] %v1442_v34  ;;  %1168 = vst [vmem:[%s2373_s15 + $0x18] sm:$0xff] %v1443_v35 }
 0x1f3 PF: > { %s2615_s18 = sld [smem:[#allocation15_spill]]  ;;  %s2616_s9 = sld [smem:[#allocation21_spill]] }
 0x1f4   : > { %s1183_s6 = sshll.u32 %s2373_s15, 4  ;;  %s1170_s3 = scalar_lea.sflag [#allocation5], %s2363_s29  ;;  %s2488_s6 = int_to_ptr.vmem [resolvable:$true] %s1183_s6 }
 0x1f5   : > { %s1842_s1 = scalar_lea.vmem %s2488_s6, 512  ;;  %p2617_p0 = scmp.ne.s32.totalorder %s2605_s7, 0 }
 0x1f6   : > { %p1843_p3 = scmp.ne.s32.totalorder %s2488_s6, %s1842_s1  ;;  %s2009_s10 = smov [#allocation9]  }
 0x1f7   : > { %s1846_s8 = sshll.u32 %s2009_s10, 4  ;;  %s1847_s8 = int_to_ptr.vmem [resolvable:$false] %s1846_s8 }
 0x1f8   : > { %p1844_p8 = pnand %p1843_p3, %p2617_p0  ;;  %s1848_s11 = scalar_lea.vmem %s1847_s8, 1024 }
 0x1f9   : > { %s1444_s30 = sshll.u32 %s2615_s18, 8  ;;  %p1849_p7 = scmp.lt.s32.totalorder %s2488_s6, %s1847_s8 }
 0x1fa   : > { %s2485_s5 = scalar_lea.hbm %s2616_s9, %s1444_s30  ;;  %p1845_p12 = pneg %p1844_p8 }
 0x1fb   : > { %p1850_p5 = scmp.lt.s32.totalorder %s1848_s11, %s1842_s1 }
 0x1fd   : > { %p1851_p13 = por %p1850_p5, %p1849_p7 }
 0x1ff   : > { %p1852_p10 = pnand %p1851_p13, %p1845_p12 }
 0x201   : > { %1855 = shalt.err (!%p1852_p10)
}
 0x202   : > { %s1856_s15 = scalar_lea.hbm %s2485_s5, 512  ;;  %s1860_s18 = scalar_lea.hbm %s2616_s9, 1024 }
 0x203   : > { %p1857_p6 = scmp.ne.s32.totalorder %s2485_s5, %s1856_s15  ;;  %p1861_p2 = scmp.lt.u32.totalorder %s2485_s5, %s2616_s9 }
 0x204   : > { %p1862_p4 = scmp.lt.u32.totalorder %s1860_s18, %s1856_s15  ;;  %p1864_p3 = scmp.lt.u32.totalorder %s1856_s15, %s2485_s5 }
 0x205   : > { %p1858_p9 = pnand %p1857_p6, %p2617_p0 }
 0x206   : > { %p1863_p1 = por %p1862_p4, %p1861_p2 }
 0x207   : > { %p1859_p11 = pneg %p1858_p9 }
 0x208   : > { %p1865_p8 = por %p1864_p3, %p1863_p1 }
 0x20a   : > { %p1866_p12 = pnand %p1865_p8, %p1859_p11 }
 0x20c   : > { %1869 = shalt.err (!%p1866_p12)
}
 0x20d   : > { %s2010_s0 = smov 256   ;;  %s2011_s1 = smov 512  }
 0x20e   : > { %s2012_s10 = smov 16  }
 0x20f   : > { %1463 = dma.vmem_to_hbm [thread:$0]  (%p2617_p0), %s2488_s6, 512, %s2485_s5, %s1170_s3, %s2010_s0, %s2011_s1, %s2012_s10  }
 0x210 PF: > { %p1480_p7 = scmp.ge.s32.totalorder %s1996_s25, 2  ;;  %s1198_s8 = sand.u32 1, %s1944_s12  }
 0x211   : > { %p2618_p5 = scmp.ne.s32.totalorder %s2607_s4, 0  ;;  %s1199_s11 = scalar_lea.sflag [#allocation5], %s1198_s8 }
 0x213   : > { %p1476_p13 = pnand %p1480_p7, %p2618_p5 }
 0x215   : > { %1939 = dma.done.wait (!%p1476_p13), %s1199_s11, 512  }
 0x216   : > { %1941 = vsyncadd (!%p1476_p13), %s1199_s11, 4294966784  ;;  %s22_s25 = sadd.s32 1, %s1996_s25   ;;  %s2620_s4 = sld [smem:[#allocation16_spill]] }
 0x217   : > { %p2519_p10 = scmp.ge.s32.totalorder %s22_s25, 6   ;;  %s2621_s7 = sld [smem:[#allocation17_spill]] }
 0x218   : > { %s2622_s29 = sld [smem:[#allocation18_spill]]  ;;  %s2624_s12 = smov %s1948_s13 }
 0x219   : > { %s2625_s13 = smov %s1952_s14  ;;  %s2626_s14 = smov %s2288_s21 }
 0x21a   : > { %s2627_s15 = smov %s1960_s16  ;;  %s2628_s16 = smov %s1964_s17 }
 0x21b   : > { %s2629_s17 = smov %s2293_s23  ;;  %s2630_s18 = smov %s1972_s19 }
 0x21c   : > { %s2631_s19 = smov %s1976_s20  ;;  %s2632_s20 = smov %s2186_s27 }
 0x21d   : > { %s2633_s21 = smov %s2620_s4  ;;  %s2634_s22 = smov %s1992_s24 }
 0x21e   : > { %s2635_s23 = smov %s2621_s7  ;;  %s2636_s24 = smov %s2622_s29 }
 0x21f   :  { %21 = sbr.rel (!%p2519_p10) target bundleno = 16 (0x10), region = 109 }
 0x226   :  { %1204 = vsyncpa [#allocation4], 1 }
 0x227   :  { %1206 = vsyncpa [#allocation4 + $0x1], 1 }
 0x228   :  { %1207 = vsyncpa [#allocation7], 1 }
 0x229   :  { %1209 = vsyncpa [#allocation7 + $0x1], 1 }
 0x22a   :  { %1210 = vsyncpa [#allocation5], 1 }
 0x22b   :  { %1212 = vsyncpa [#allocation5 + $0x1], 1 }

</bundles_post_ra>
